<compile_context>
chip_gen: v6e
topology: v6e:2x2x1
jax: 0.10.0
libtpu: 0.0.40
codegen_flags: <defaults>
</compile_context>

<pallas_src>
import math

import numpy as np

import jax
import jax.numpy as jnp
from jax import lax
from jax.experimental import pallas as pl
from jax.experimental.pallas import tpu as pltpu


# ----------------------------- window helpers (reference only) -------------- #

def get_window_indices(seq_len: int, window_size: int) -> np.ndarray:
    """Mirror of MultiHeadLatentAttention._get_window_indices (static)."""
    half = window_size // 2
    rows = []
    for i in range(seq_len):
        ws = max(0, i - half)
        we = min(seq_len, i + half + 1)
        window = list(range(ws, we))
        if len(window) < window_size:
            pad = window_size - len(window)
            if ws == 0:
                window = window + [seq_len - 1] * pad
            else:
                window = [0] * pad + window
        rows.append(window)
    return np.asarray(rows, dtype=np.int32)


def _pick_query_tile(S: int, half: int, max_tile: int) -> int:
    """Largest query tile <= max_tile that divides S, is a multiple of 8 and >= half."""
    if S <= max_tile:
        return S
    for d in range(max_tile - (max_tile % 8), max(half, 8) - 1, -8):
        if d > 0 and S % d == 0:
            return d
    return S                      # fall back to a single (untiled) query block


# ------------------------------ Pallas kernel ------------------------------ #

def mhla_pallas(x, params, *, num_heads: int, window_size: int,
                compute_dtype=jnp.float32, out_dtype=jnp.float32,
                max_query_tile: int = 256):
    B, S, E = x.shape
    H = num_heads
    D = E // H
    assert D * H == E
    W = window_size
    half = W // 2
    scale = 1.0 / math.sqrt(D)

    # ---------------- query-tile / key-band geometry ----------------------- #
    # max_query_tile: 256 matches the v6e/v7x 2x256^2 MXU; use 128 on v5e.
    TQ = _pick_query_tile(S, half, max_query_tile)
    nT = S // TQ
    if nT == 1:
        slab_fns = [lambda t: t]                 # band == the single query block
        separate_kv = False                      # reuse the x_q block, no extra DMA
    elif nT == 2:
        slab_fns = [lambda t: (t + 1) % 2, lambda t: t]
        separate_kv = True
    else:
        # left neighbor (wraps to last block -> key S-1 padding for tile 0),
        # own block, right neighbor (wraps to block 0 -> key 0 padding for last tile)
        slab_fns = [lambda t: (t + nT - 1) % nT,
                    lambda t: t,
                    lambda t: (t + 1) % nT]
        separate_kv = True
    n_slabs = len(slab_fns)
    n_kv = n_slabs if separate_kv else 0
    TKV = n_slabs * TQ

    # ---------------- offline weight fusion -------------------------------- #
    Wqkv, bqkv = params["Wqkv"], params["bqkv"]                   # (3E, E), (3E,)
    Wl, bl = params["Wl"], params["bl"]                           # (D, D), (D,)
    Wp, bp = params["Wp"], params["bp"]                           # (E, E), (E,)

    Wq, Wk, Wv = Wqkv[:E], Wqkv[E:2 * E], Wqkv[2 * E:]
    bq, bk, bv = bqkv[:E], bqkv[E:2 * E], bqkv[2 * E:]

    # Q: fold the 1/sqrt(D) score scale into weights + bias.
    wq = (Wq.T * scale).astype(compute_dtype)                     # (E, E)
    bq2 = (bq * scale).reshape(1, E).astype(jnp.float32)

    # K/V: fold the latent projection Wl into the per-head input projection.
    Wk_h = Wk.reshape(H, D, E)
    Wv_h = Wv.reshape(H, D, E)
    wkT = jnp.einsum("ij,hjk->hik", Wl, Wk_h).reshape(E, E).T     # (E, E)
    wvT = jnp.einsum("ij,hjk->hik", Wl, Wv_h).reshape(E, E).T     # (E, E)
    bk_f = (bk.reshape(H, D) @ Wl.T + bl).reshape(E)
    bv_f = (bv.reshape(H, D) @ Wl.T + bl).reshape(E)
    wkv = jnp.concatenate([wkT, wvT], axis=1).astype(compute_dtype)       # (E, 2E)
    bkv2 = jnp.concatenate([bk_f, bv_f]).reshape(1, 2 * E).astype(jnp.float32)

    # Output projection, head-major (H, D, E) so the kernel does rank-D updates.
    wp_hde = Wp.T.reshape(H, D, E).astype(compute_dtype)
    bp2 = bp.reshape(1, E).astype(jnp.float32)

    x_in = x.astype(compute_dtype)

    # -------------------------------- kernel ------------------------------- #
    def kernel(*refs):
        xq_ref = refs[0]
        band_refs = refs[1:1 + n_kv] if separate_kv else (refs[0],)
        wq_ref, bq_ref, wkv_ref, bkv_ref, wp_ref, bp_ref = refs[1 + n_kv:7 + n_kv]
        out_ref = refs[7 + n_kv]
        qbuf, kvbuf, bias_buf, acc = refs[8 + n_kv:12 + n_kv]

        t = pl.program_id(1)

        # Fused, scale-folded Q projection for all heads (one MXU pass), staged
        # to VMEM so per-head slices are re-read instead of kept live in vregs.
        qbuf[...] = (jnp.dot(xq_ref[...], wq_ref[...],
                             preferred_element_type=jnp.float32)
                     + bq_ref[...]).astype(compute_dtype)

        # Fused, Wl-folded K/V projection of the band-limited key slabs.
        if n_slabs > 1:
            xband = jnp.concatenate([r[...] for r in band_refs], axis=0)
        else:
            xband = band_refs[0][...]
        kvbuf[...] = (jnp.dot(xband, wkv_ref[...],
                              preferred_element_type=jnp.float32)
                      + bkv_ref[...]).astype(compute_dtype)

        # ---- in-kernel window mask / log-multiplicity bias (f32, no HBM) ---
        q_abs = t * TQ + lax.broadcasted_iota(jnp.int32, (TQ, TQ), 0)   # query idx
        lane = lax.broadcasted_iota(jnp.int32, (TQ, TQ), 1)
        ws = jnp.maximum(q_abs - half, 0)
        we = jnp.minimum(q_abs + half + 1, S)
        k_abs = [fn(t) * TQ + lane for fn in slab_fns]                  # key idx / slab
        in_band = [(ka >= ws) & (ka < we) for ka in k_abs]

        NEG = jnp.float32(-1e30)
        is_edge = jnp.logical_or(t == 0, t == nT - 1)

        @pl.when(is_edge)
        def _():
            # Edge query tiles: torch.gather pads truncated windows with key S-1
            # (left edge) or key 0 (right edge); a key occurring c times in a
            # window is an additive log(c) bias on its score.
            pad = (W - (we - ws)).astype(jnp.float32)
            pad_key = jnp.where(ws == 0, S - 1, 0)
            pieces = []
            for ka, ib in zip(k_abs, in_band):
                count = ib.astype(jnp.float32) + jnp.where(
                    (pad > 0.0) & (ka == pad_key), pad, 0.0)
                pieces.append(jnp.where(count > 0.0,
                                        jnp.log(jnp.maximum(count, 1.0)), NEG))
            bias_buf[...] = (jnp.concatenate(pieces, axis=1)
                             if n_slabs > 1 else pieces[0])

        @pl.when(jnp.logical_not(is_edge))
        def _():
            # Interior tiles: every in-window count == 1 -> pure band mask.
            pieces = [jnp.where(ib, 0.0, NEG) for ib in in_band]
            bias_buf[...] = (jnp.concatenate(pieces, axis=1)
                             if n_slabs > 1 else pieces[0])

        # ---- per-head windowed attention + rank-D output-projection update --
        acc[...] = jnp.zeros_like(acc)
        for h in range(H):   # static unroll; operands re-read from VMEM each head
            q_h = qbuf[:, h * D:(h + 1) * D]                  # (TQ, D)
            k_h = kvbuf[:, h * D:(h + 1) * D]                 # (TKV, D)
            v_h = kvbuf[:, E + h * D:E + (h + 1) * D]         # (TKV, D)

            s = lax.dot_general(q_h, k_h, (((1,), (1,)), ((), ())),
                                preferred_element_type=jnp.float32)   # (TQ, TKV) f32
            s = s + bias_buf[...]                                     # f32 mask/bias

            m = jnp.max(s, axis=-1, keepdims=True)
            ex = jnp.exp(s - m)
            p = ex * pl.reciprocal(jnp.sum(ex, axis=-1, keepdims=True), approx=True)

            hv = jnp.dot(p.astype(compute_dtype), v_h,
                         preferred_element_type=jnp.float32)          # (TQ, D)
            # Lane-dense (E-wide) accumulation of the output projection.
            acc[...] += jnp.dot(hv.astype(compute_dtype), wp_ref[h],
                                preferred_element_type=jnp.float32)   # (TQ, E)

        out_ref[...] = (acc[...] + bp_ref[...]).astype(out_dtype)

    # -------------------------------- specs -------------------------------- #
    x_spec = pl.BlockSpec((None, TQ, E), lambda b, t: (b, t, 0))
    kv_specs = ([pl.BlockSpec((None, TQ, E), (lambda b, t, fn=fn: (b, fn(t), 0)))
                 for fn in slab_fns] if separate_kv else [])
    const2 = lambda b, t: (0, 0)
    const3 = lambda b, t: (0, 0, 0)
    in_specs = [x_spec] + kv_specs + [
        pl.BlockSpec((E, E), const2),          # wq   (scale folded)
        pl.BlockSpec((1, E), const2),          # bq
        pl.BlockSpec((E, 2 * E), const2),      # wkv  (Wl folded), [K | V] columns
        pl.BlockSpec((1, 2 * E), const2),      # bkv
        pl.BlockSpec((H, D, E), const3),       # Wp^T, head-major
        pl.BlockSpec((1, E), const2),          # bp
    ]

    kv_args = (x_in,) * n_kv

    out = pl.pallas_call(
        kernel,
        out_shape=jax.ShapeDtypeStruct((B, S, E), out_dtype),
        grid_spec=pltpu.PrefetchScalarGridSpec(
            num_scalar_prefetch=0,
            grid=(B, nT),
            in_specs=in_specs,
            out_specs=pl.BlockSpec((None, TQ, E), lambda b, t: (b, t, 0)),
            scratch_shapes=[
                pltpu.VMEM((TQ, E), compute_dtype),        # staged Q projection
                pltpu.VMEM((TKV, 2 * E), compute_dtype),   # staged K|V band projection
                pltpu.VMEM((TQ, TKV), jnp.float32),        # window mask / log-count bias
                pltpu.VMEM((TQ, E), jnp.float32),          # output accumulator
            ]),
        compiler_params=pltpu.CompilerParams(
            dimension_semantics=("parallel", "parallel"),
            vmem_limit_bytes=48 * 1024 * 1024),
    )(x_in, *kv_args, wq, bq2, wkv, bkv2, wp_hde, bp2)
    return out


# ----------------------------- pure-JAX reference --------------------------- #

def mhla_reference(x, params, *, num_heads: int, window_size: int):
    B, S, E = x.shape
    H = num_heads
    D = E // H
    qkv = x @ params["Wqkv"].T + params["bqkv"]                   # (B, S, 3E)
    qkv = qkv.reshape(B, S, 3, H, D).transpose(2, 0, 3, 1, 4)     # (3, B, H, S, D)
    q, k, v = qkv[0], qkv[1], qkv[2]
    k_lat = k @ params["Wl"].T + params["bl"]
    v_lat = v @ params["Wl"].T + params["bl"]
    widx = jnp.asarray(get_window_indices(S, window_size))        # (S, W)
    kw = k_lat[:, :, widx, :]                                     # (B, H, S, W, D)
    vw = v_lat[:, :, widx, :]
    attn = jnp.einsum("bhsd,bhswd->bhsw", q, kw) / math.sqrt(D)
    attn = jax.nn.softmax(attn, axis=-1)
    out = jnp.einsum("bhsw,bhswd->bhsd", attn, vw)
    out = out.transpose(0, 2, 1, 3).reshape(B, S, E)
    return out @ params["Wp"].T + params["bp"]


# ---------------------------------- main ------------------------------------ #

def _make_params(key, E, D):
    ks = jax.random.split(key, 6)
    return {
        "Wqkv": jax.random.normal(ks[0], (3 * E, E), jnp.float32) * 0.05,
        "bqkv": jax.random.normal(ks[1], (3 * E,), jnp.float32) * 0.05,
        "Wl":   jax.random.normal(ks[2], (D, D), jnp.float32) * 0.05,
        "bl":   jax.random.normal(ks[3], (D,), jnp.float32) * 0.05,
        "Wp":   jax.random.normal(ks[4], (E, E), jnp.float32) * 0.05,
        "bp":   jax.random.normal(ks[5], (E,), jnp.float32) * 0.05,
    }


if __name__ == "__main__":
    B, S, E, H, W = 2, 8, 32, 4, 7
    D = E // H

    key = jax.random.PRNGKey(0)
    kp, kx, kx2 = jax.random.split(key, 3)
    params = _make_params(kp, E, D)
    x = jax.random.normal(kx, (B, S, E), jnp.float32)

    ref = jax.block_until_ready(
        mhla_reference(x, params, num_heads=H, window_size=W))

    # 1) f32 operands, single-tile path (S fits one query tile).
    out = jax.block_until_ready(
        mhla_pallas(x, params, num_heads=H, window_size=W,
                    compute_dtype=jnp.float32, out_dtype=jnp.float32))
    assert out.shape == (B, S, E)
    np.testing.assert_allclose(np.asarray(out), np.asarray(ref),
                               rtol=1e-2, atol=2e-3)

    # 2) bf16 matmul operands + bf16 output (f32 accumulation / softmax): loose check.
    out_bf16 = jax.block_until_ready(
        mhla_pallas(x, params, num_heads=H, window_size=W,
                    compute_dtype=jnp.bfloat16, out_dtype=jnp.bfloat16))
    np.testing.assert_allclose(np.asarray(out_bf16.astype(jnp.float32)),
                               np.asarray(ref), rtol=5e-2, atol=5e-2)

    # 3) Tiled query axis + band-limited keys (forced small tile to exercise the
    #    edge/interior/wrap-around band logic at small shapes).
    S2 = 32
    x2 = jax.random.normal(kx2, (B, S2, E), jnp.float32)
    ref2 = jax.block_until_ready(
        mhla_reference(x2, params, num_heads=H, window_size=W))
    out2 = jax.block_until_ready(
        mhla_pallas(x2, params, num_heads=H, window_size=W,
                    compute_dtype=jnp.float32, out_dtype=jnp.float32,
                    max_query_tile=8))
    np.testing.assert_allclose(np.asarray(out2), np.asarray(ref2),
                               rtol=1e-2, atol=2e-3)

    print("KERNEL_OK")
</pallas_src>

<mosaic_0001>
module attributes {stable_mosaic.version = 11 : i64} {
  func.func @kernel(%arg0: i32, %arg1: i32, %arg2: memref<1x8x32xf32, #tpu.memory_space<vmem>>, %arg3: memref<32x32xf32, #tpu.memory_space<vmem>>, %arg4: memref<1x32xf32, #tpu.memory_space<vmem>>, %arg5: memref<32x64xf32, #tpu.memory_space<vmem>>, %arg6: memref<1x64xf32, #tpu.memory_space<vmem>>, %arg7: memref<4x8x32xf32, #tpu.memory_space<vmem>>, %arg8: memref<1x32xf32, #tpu.memory_space<vmem>>, %arg9: memref<1x8x32xf32, #tpu.memory_space<vmem>>, %arg10: memref<8x32xf32, #tpu.memory_space<vmem>>, %arg11: memref<8x64xf32, #tpu.memory_space<vmem>>, %arg12: memref<8x8xf32, #tpu.memory_space<vmem>>, %arg13: memref<8x32xf32, #tpu.memory_space<vmem>>) attributes {dimension_semantics = [#tpu.dimension_semantics<parallel>, #tpu.dimension_semantics<parallel>], iteration_bounds = array<i64: 2, 1>, scalar_prefetch = 0 : i64, scratch_operands = 4 : i64, tpu.core_type = #tpu.core_type<tc>, window_params = [{transform_indices = @transform_0, window_bounds = array<i64: 1, 8, 32>}, {pipeline_mode = #tpu.pipeline_mode<synchronous>, transform_indices = @transform_1, window_bounds = array<i64: 32, 32>}, {pipeline_mode = #tpu.pipeline_mode<synchronous>, transform_indices = @transform_2, window_bounds = array<i64: 1, 32>}, {pipeline_mode = #tpu.pipeline_mode<synchronous>, transform_indices = @transform_3, window_bounds = array<i64: 32, 64>}, {pipeline_mode = #tpu.pipeline_mode<synchronous>, transform_indices = @transform_4, window_bounds = array<i64: 1, 64>}, {pipeline_mode = #tpu.pipeline_mode<synchronous>, transform_indices = @transform_5, window_bounds = array<i64: 4, 8, 32>}, {pipeline_mode = #tpu.pipeline_mode<synchronous>, transform_indices = @transform_6, window_bounds = array<i64: 1, 32>}, {transform_indices = @transform_7, window_bounds = array<i64: 1, 8, 32>}]} {
    %c0 = arith.constant 0 : index
    %c0_0 = arith.constant 0 : index
    %c0_1 = arith.constant 0 : index
    %0 = vector.load %arg2[%c0, %c0_0, %c0_1] : memref<1x8x32xf32, #tpu.memory_space<vmem>>, vector<1x8x32xf32>
    %1 = vector.shape_cast %0 : vector<1x8x32xf32> to vector<8x32xf32>
    %c0_2 = arith.constant 0 : index
    %c0_3 = arith.constant 0 : index
    %2 = vector.load %arg3[%c0_2, %c0_3] : memref<32x32xf32, #tpu.memory_space<vmem>>, vector<32x32xf32>
    %cst = arith.constant dense<0.000000e+00> : vector<8x32xf32>
    %3 = tpu.matmul %1, %2, %cst {dimension_numbers = #tpu.dot_dimension_numbers<[1], [0], [0], [1], [0, 0, 1, 1], [], []>} : vector<8x32xf32>, vector<32x32xf32>, vector<8x32xf32> -> vector<8x32xf32>
    %c0_4 = arith.constant 0 : index
    %c0_5 = arith.constant 0 : index
    %4 = vector.load %arg4[%c0_4, %c0_5] : memref<1x32xf32, #tpu.memory_space<vmem>>, vector<1x32xf32>
    %5 = vector.broadcast %4 : vector<1x32xf32> to vector<8x32xf32>
    %6 = arith.addf %3, %5 : vector<8x32xf32>
    %c0_6 = arith.constant 0 : index
    %c0_7 = arith.constant 0 : index
    %7 = vector.load %arg10[%c0_6, %c0_7] : memref<8x32xf32, #tpu.memory_space<vmem>>, vector<8x32xf32>
    tpu.vector_store %arg10[%c0_6, %c0_7], %6 {strides = array<i32>} : memref<8x32xf32, #tpu.memory_space<vmem>>, vector<8x32xf32>,
    %c0_8 = arith.constant 0 : index
    %c0_9 = arith.constant 0 : index
    %c0_10 = arith.constant 0 : index
    %8 = vector.load %arg2[%c0_8, %c0_9, %c0_10] : memref<1x8x32xf32, #tpu.memory_space<vmem>>, vector<1x8x32xf32>
    %9 = vector.shape_cast %8 : vector<1x8x32xf32> to vector<8x32xf32>
    %c0_11 = arith.constant 0 : index
    %c0_12 = arith.constant 0 : index
    %10 = vector.load %arg5[%c0_11, %c0_12] : memref<32x64xf32, #tpu.memory_space<vmem>>, vector<32x64xf32>
    %cst_13 = arith.constant dense<0.000000e+00> : vector<8x64xf32>
    %11 = tpu.matmul %9, %10, %cst_13 {dimension_numbers = #tpu.dot_dimension_numbers<[1], [0], [0], [1], [0, 0, 1, 1], [], []>} : vector<8x32xf32>, vector<32x64xf32>, vector<8x64xf32> -> vector<8x64xf32>
    %c0_14 = arith.constant 0 : index
    %c0_15 = arith.constant 0 : index
    %12 = vector.load %arg6[%c0_14, %c0_15] : memref<1x64xf32, #tpu.memory_space<vmem>>, vector<1x64xf32>
    %13 = vector.broadcast %12 : vector<1x64xf32> to vector<8x64xf32>
    %14 = arith.addf %11, %13 : vector<8x64xf32>
    %c0_16 = arith.constant 0 : index
    %c0_17 = arith.constant 0 : index
    %15 = vector.load %arg11[%c0_16, %c0_17] : memref<8x64xf32, #tpu.memory_space<vmem>>, vector<8x64xf32>
    tpu.vector_store %arg11[%c0_16, %c0_17], %14 {strides = array<i32>} : memref<8x64xf32, #tpu.memory_space<vmem>>, vector<8x64xf32>,
    %c8_i32 = arith.constant 8 : i32
    %16 = arith.muli %arg1, %c8_i32 : i32
    %17 = tpu.iota {dimensions = array<i32: 0>} : vector<8x8xi32>
    %18 = vector.broadcast %16 : i32 to vector<8x8xi32>
    %19 = arith.addi %18, %17 : vector<8x8xi32>
    %20 = tpu.iota {dimensions = array<i32: 1>} : vector<8x8xi32>
    %c3_i32 = arith.constant 3 : i32
    %21 = vector.broadcast %c3_i32 : i32 to vector<8x8xi32>
    %22 = arith.subi %19, %21 : vector<8x8xi32>
    %c0_i32 = arith.constant 0 : i32
    %23 = vector.broadcast %c0_i32 : i32 to vector<8x8xi32>
    %24 = arith.maxsi %22, %23 : vector<8x8xi32>
    %c3_i32_18 = arith.constant 3 : i32
    %25 = vector.broadcast %c3_i32_18 : i32 to vector<8x8xi32>
    %26 = arith.addi %19, %25 : vector<8x8xi32>
    %c1_i32 = arith.constant 1 : i32
    %27 = vector.broadcast %c1_i32 : i32 to vector<8x8xi32>
    %28 = arith.addi %26, %27 : vector<8x8xi32>
    %c8_i32_19 = arith.constant 8 : i32
    %29 = vector.broadcast %c8_i32_19 : i32 to vector<8x8xi32>
    %30 = arith.minsi %28, %29 : vector<8x8xi32>
    %c8_i32_20 = arith.constant 8 : i32
    %31 = arith.muli %arg1, %c8_i32_20 : i32
    %32 = vector.broadcast %31 : i32 to vector<8x8xi32>
    %33 = arith.addi %32, %20 : vector<8x8xi32>
    %34 = arith.cmpi sge, %33, %24 : vector<8x8xi32>
    %35 = arith.cmpi slt, %33, %30 : vector<8x8xi32>
    %36 = arith.andi %34, %35 : vector<8x8xi1>
    %c0_i32_21 = arith.constant 0 : i32
    %37 = arith.cmpi eq, %arg1, %c0_i32_21 : i32
    %c0_i32_22 = arith.constant 0 : i32
    %38 = arith.cmpi eq, %arg1, %c0_i32_22 : i32
    %39 = arith.ori %37, %38 : i1
    %40 = arith.extui %39 : i1 to i32
    %cst_23 = arith.constant -1.000000e+30 : f32
    %c0_i32_24 = arith.constant 0 : i32
    %41 = arith.cmpi ne, %40, %c0_i32_24 : i32
    scf.if %41 {
      %146 = arith.subi %30, %24 : vector<8x8xi32>
      %c7_i32 = arith.constant 7 : i32
      %147 = vector.broadcast %c7_i32 : i32 to vector<8x8xi32>
      %148 = arith.subi %147, %146 : vector<8x8xi32>
      %149 = arith.sitofp %148 : vector<8x8xi32> to vector<8x8xf32>
      %c0_i32_107 = arith.constant 0 : i32
      %150 = vector.broadcast %c0_i32_107 : i32 to vector<8x8xi32>
      %151 = arith.cmpi eq, %24, %150 : vector<8x8xi32>
      %c7_i32_108 = arith.constant 7 : i32
      %c0_i32_109 = arith.constant 0 : i32
      %152 = vector.broadcast %c7_i32_108 : i32 to vector<8x8xi32>
      %153 = vector.broadcast %c0_i32_109 : i32 to vector<8x8xi32>
      %154 = arith.select %151, %152, %153 : vector<8x8xi1>, vector<8x8xi32>
      %155 = arith.extui %36 : vector<8x8xi1> to vector<8x8xi32>
      %156 = arith.sitofp %155 : vector<8x8xi32> to vector<8x8xf32>
      %cst_110 = arith.constant 0.000000e+00 : f32
      %157 = vector.broadcast %cst_110 : f32 to vector<8x8xf32>
      %158 = arith.cmpf ogt, %149, %157 : vector<8x8xf32>
      %159 = arith.cmpi eq, %33, %154 : vector<8x8xi32>
      %160 = arith.andi %158, %159 : vector<8x8xi1>
      %cst_111 = arith.constant 0.000000e+00 : f32
      %161 = vector.broadcast %cst_111 : f32 to vector<8x8xf32>
      %162 = arith.select %160, %149, %161 : vector<8x8xi1>, vector<8x8xf32>
      %163 = arith.addf %156, %162 : vector<8x8xf32>
      %cst_112 = arith.constant 0.000000e+00 : f32
      %164 = vector.broadcast %cst_112 : f32 to vector<8x8xf32>
      %165 = arith.cmpf ogt, %163, %164 : vector<8x8xf32>
      %cst_113 = arith.constant 1.000000e+00 : f32
      %166 = vector.broadcast %cst_113 : f32 to vector<8x8xf32>
      %167 = arith.maximumf %163, %166 : vector<8x8xf32>
      %168 = math.log %167 : vector<8x8xf32>
      %169 = vector.broadcast %cst_23 : f32 to vector<8x8xf32>
      %170 = arith.select %165, %168, %169 : vector<8x8xi1>, vector<8x8xf32>
      %c0_114 = arith.constant 0 : index
      %c0_115 = arith.constant 0 : index
      %171 = vector.load %arg12[%c0_114, %c0_115] : memref<8x8xf32, #tpu.memory_space<vmem>>, vector<8x8xf32>
      tpu.vector_store %arg12[%c0_114, %c0_115], %170 {strides = array<i32>} : memref<8x8xf32, #tpu.memory_space<vmem>>, vector<8x8xf32>,
    } else {
    }
    %true = arith.constant true
    %42 = arith.xori %39, %true : i1
    %43 = arith.extui %42 : i1 to i32
    %cst_25 = arith.constant -1.000000e+30 : f32
    %c0_i32_26 = arith.constant 0 : i32
    %44 = arith.cmpi ne, %43, %c0_i32_26 : i32
    scf.if %44 {
      %cst_107 = arith.constant 0.000000e+00 : f32
      %146 = vector.broadcast %cst_107 : f32 to vector<8x8xf32>
      %147 = vector.broadcast %cst_25 : f32 to vector<8x8xf32>
      %148 = arith.select %36, %146, %147 : vector<8x8xi1>, vector<8x8xf32>
      %c0_108 = arith.constant 0 : index
      %c0_109 = arith.constant 0 : index
      %149 = vector.load %arg12[%c0_108, %c0_109] : memref<8x8xf32, #tpu.memory_space<vmem>>, vector<8x8xf32>
      tpu.vector_store %arg12[%c0_108, %c0_109], %148 {strides = array<i32>} : memref<8x8xf32, #tpu.memory_space<vmem>>, vector<8x8xf32>,
    } else {
    }
    %cst_27 = arith.constant 0.000000e+00 : f32
    %45 = vector.broadcast %cst_27 : f32 to vector<8x32xf32>
    %c0_28 = arith.constant 0 : index
    %c0_29 = arith.constant 0 : index
    %46 = vector.load %arg13[%c0_28, %c0_29] : memref<8x32xf32, #tpu.memory_space<vmem>>, vector<8x32xf32>
    tpu.vector_store %arg13[%c0_28, %c0_29], %45 {strides = array<i32>} : memref<8x32xf32, #tpu.memory_space<vmem>>, vector<8x32xf32>,
    %c0_30 = arith.constant 0 : index
    %c0_31 = arith.constant 0 : index
    %47 = vector.load %arg10[%c0_30, %c0_31] : memref<8x32xf32, #tpu.memory_space<vmem>>, vector<8x8xf32>
    %c0_32 = arith.constant 0 : index
    %c0_33 = arith.constant 0 : index
    %48 = vector.load %arg11[%c0_32, %c0_33] : memref<8x64xf32, #tpu.memory_space<vmem>>, vector<8x8xf32>
    %c0_34 = arith.constant 0 : index
    %c32 = arith.constant 32 : index
    %49 = vector.load %arg11[%c0_34, %c32] : memref<8x64xf32, #tpu.memory_space<vmem>>, vector<8x8xf32>
    %cst_35 = arith.constant dense<0.000000e+00> : vector<8x8xf32>
    %50 = tpu.matmul %47, %48, %cst_35 {dimension_numbers = #tpu.dot_dimension_numbers<[1], [1], [0], [0], [0, 0, 1, 0], [], []>} : vector<8x8xf32>, vector<8x8xf32>, vector<8x8xf32> -> vector<8x8xf32>
    %c0_36 = arith.constant 0 : index
    %c0_37 = arith.constant 0 : index
    %51 = vector.load %arg12[%c0_36, %c0_37] : memref<8x8xf32, #tpu.memory_space<vmem>>, vector<8x8xf32>
    %52 = arith.addf %50, %51 : vector<8x8xf32>
    %cst_38 = arith.constant dense<0xFF800000> : vector<8xf32>
    %53 = vector.multi_reduction <maximumf>, %52, %cst_38 [1] : vector<8x8xf32> to vector<8xf32>
    %54 = vector.shape_cast %53 : vector<8xf32> to vector<8x1xf32>
    %55 = vector.broadcast %54 : vector<8x1xf32> to vector<8x8xf32>
    %56 = arith.subf %52, %55 : vector<8x8xf32>
    %57 = math.exp %56 : vector<8x8xf32>
    %cst_39 = arith.constant dense<0.000000e+00> : vector<8xf32>
    %58 = vector.multi_reduction <add>, %57, %cst_39 [1] : vector<8x8xf32> to vector<8xf32>
    %59 = vector.shape_cast %58 : vector<8xf32> to vector<8x1xf32>
    %60 = tpu.reciprocal %59 {approx = true} : vector<8x1xf32> -> vector<8x1xf32>
    %61 = vector.broadcast %60 : vector<8x1xf32> to vector<8x8xf32>
    %62 = arith.mulf %57, %61 : vector<8x8xf32>
    %cst_40 = arith.constant dense<0.000000e+00> : vector<8x8xf32>
    %63 = tpu.matmul %62, %49, %cst_40 {dimension_numbers = #tpu.dot_dimension_numbers<[1], [0], [0], [1], [0, 0, 1, 1], [], []>} : vector<8x8xf32>, vector<8x8xf32>, vector<8x8xf32> -> vector<8x8xf32>
    %c0_41 = arith.constant 0 : index
    %c0_42 = arith.constant 0 : index
    %64 = vector.load %arg13[%c0_41, %c0_42] : memref<8x32xf32, #tpu.memory_space<vmem>>, vector<8x32xf32>
    %c0_43 = arith.constant 0 : index
    %c0_44 = arith.constant 0 : index
    %c0_45 = arith.constant 0 : index
    %65 = vector.load %arg7[%c0_43, %c0_44, %c0_45] : memref<4x8x32xf32, #tpu.memory_space<vmem>>, vector<1x8x32xf32>
    %66 = vector.shape_cast %65 : vector<1x8x32xf32> to vector<8x32xf32>
    %cst_46 = arith.constant dense<0.000000e+00> : vector<8x32xf32>
    %67 = tpu.matmul %63, %66, %cst_46 {dimension_numbers = #tpu.dot_dimension_numbers<[1], [0], [0], [1], [0, 0, 1, 1], [], []>} : vector<8x8xf32>, vector<8x32xf32>, vector<8x32xf32> -> vector<8x32xf32>
    %68 = arith.addf %64, %67 : vector<8x32xf32>
    %c0_47 = arith.constant 0 : index
    %c0_48 = arith.constant 0 : index
    %69 = vector.load %arg13[%c0_47, %c0_48] : memref<8x32xf32, #tpu.memory_space<vmem>>, vector<8x32xf32>
    tpu.vector_store %arg13[%c0_47, %c0_48], %68 {strides = array<i32>} : memref<8x32xf32, #tpu.memory_space<vmem>>, vector<8x32xf32>,
    %c0_49 = arith.constant 0 : index
    %c8 = arith.constant 8 : index
    %70 = vector.load %arg10[%c0_49, %c8] : memref<8x32xf32, #tpu.memory_space<vmem>>, vector<8x8xf32>
    %c0_50 = arith.constant 0 : index
    %c8_51 = arith.constant 8 : index
    %71 = vector.load %arg11[%c0_50, %c8_51] : memref<8x64xf32, #tpu.memory_space<vmem>>, vector<8x8xf32>
    %c0_52 = arith.constant 0 : index
    %c40 = arith.constant 40 : index
    %72 = vector.load %arg11[%c0_52, %c40] : memref<8x64xf32, #tpu.memory_space<vmem>>, vector<8x8xf32>
    %cst_53 = arith.constant dense<0.000000e+00> : vector<8x8xf32>
    %73 = tpu.matmul %70, %71, %cst_53 {dimension_numbers = #tpu.dot_dimension_numbers<[1], [1], [0], [0], [0, 0, 1, 0], [], []>} : vector<8x8xf32>, vector<8x8xf32>, vector<8x8xf32> -> vector<8x8xf32>
    %c0_54 = arith.constant 0 : index
    %c0_55 = arith.constant 0 : index
    %74 = vector.load %arg12[%c0_54, %c0_55] : memref<8x8xf32, #tpu.memory_space<vmem>>, vector<8x8xf32>
    %75 = arith.addf %73, %74 : vector<8x8xf32>
    %cst_56 = arith.constant dense<0xFF800000> : vector<8xf32>
    %76 = vector.multi_reduction <maximumf>, %75, %cst_56 [1] : vector<8x8xf32> to vector<8xf32>
    %77 = vector.shape_cast %76 : vector<8xf32> to vector<8x1xf32>
    %78 = vector.broadcast %77 : vector<8x1xf32> to vector<8x8xf32>
    %79 = arith.subf %75, %78 : vector<8x8xf32>
    %80 = math.exp %79 : vector<8x8xf32>
    %cst_57 = arith.constant dense<0.000000e+00> : vector<8xf32>
    %81 = vector.multi_reduction <add>, %80, %cst_57 [1] : vector<8x8xf32> to vector<8xf32>
    %82 = vector.shape_cast %81 : vector<8xf32> to vector<8x1xf32>
    %83 = tpu.reciprocal %82 {approx = true} : vector<8x1xf32> -> vector<8x1xf32>
    %84 = vector.broadcast %83 : vector<8x1xf32> to vector<8x8xf32>
    %85 = arith.mulf %80, %84 : vector<8x8xf32>
    %cst_58 = arith.constant dense<0.000000e+00> : vector<8x8xf32>
    %86 = tpu.matmul %85, %72, %cst_58 {dimension_numbers = #tpu.dot_dimension_numbers<[1], [0], [0], [1], [0, 0, 1, 1], [], []>} : vector<8x8xf32>, vector<8x8xf32>, vector<8x8xf32> -> vector<8x8xf32>
    %c0_59 = arith.constant 0 : index
    %c0_60 = arith.constant 0 : index
    %87 = vector.load %arg13[%c0_59, %c0_60] : memref<8x32xf32, #tpu.memory_space<vmem>>, vector<8x32xf32>
    %c1 = arith.constant 1 : index
    %c0_61 = arith.constant 0 : index
    %c0_62 = arith.constant 0 : index
    %88 = vector.load %arg7[%c1, %c0_61, %c0_62] : memref<4x8x32xf32, #tpu.memory_space<vmem>>, vector<1x8x32xf32>
    %89 = vector.shape_cast %88 : vector<1x8x32xf32> to vector<8x32xf32>
    %cst_63 = arith.constant dense<0.000000e+00> : vector<8x32xf32>
    %90 = tpu.matmul %86, %89, %cst_63 {dimension_numbers = #tpu.dot_dimension_numbers<[1], [0], [0], [1], [0, 0, 1, 1], [], []>} : vector<8x8xf32>, vector<8x32xf32>, vector<8x32xf32> -> vector<8x32xf32>
    %91 = arith.addf %87, %90 : vector<8x32xf32>
    %c0_64 = arith.constant 0 : index
    %c0_65 = arith.constant 0 : index
    %92 = vector.load %arg13[%c0_64, %c0_65] : memref<8x32xf32, #tpu.memory_space<vmem>>, vector<8x32xf32>
    tpu.vector_store %arg13[%c0_64, %c0_65], %91 {strides = array<i32>} : memref<8x32xf32, #tpu.memory_space<vmem>>, vector<8x32xf32>,
    %c0_66 = arith.constant 0 : index
    %c16 = arith.constant 16 : index
    %93 = vector.load %arg10[%c0_66, %c16] : memref<8x32xf32, #tpu.memory_space<vmem>>, vector<8x8xf32>
    %c0_67 = arith.constant 0 : index
    %c16_68 = arith.constant 16 : index
    %94 = vector.load %arg11[%c0_67, %c16_68] : memref<8x64xf32, #tpu.memory_space<vmem>>, vector<8x8xf32>
    %c0_69 = arith.constant 0 : index
    %c48 = arith.constant 48 : index
    %95 = vector.load %arg11[%c0_69, %c48] : memref<8x64xf32, #tpu.memory_space<vmem>>, vector<8x8xf32>
    %cst_70 = arith.constant dense<0.000000e+00> : vector<8x8xf32>
    %96 = tpu.matmul %93, %94, %cst_70 {dimension_numbers = #tpu.dot_dimension_numbers<[1], [1], [0], [0], [0, 0, 1, 0], [], []>} : vector<8x8xf32>, vector<8x8xf32>, vector<8x8xf32> -> vector<8x8xf32>
    %c0_71 = arith.constant 0 : index
    %c0_72 = arith.constant 0 : index
    %97 = vector.load %arg12[%c0_71, %c0_72] : memref<8x8xf32, #tpu.memory_space<vmem>>, vector<8x8xf32>
    %98 = arith.addf %96, %97 : vector<8x8xf32>
    %cst_73 = arith.constant dense<0xFF800000> : vector<8xf32>
    %99 = vector.multi_reduction <maximumf>, %98, %cst_73 [1] : vector<8x8xf32> to vector<8xf32>
    %100 = vector.shape_cast %99 : vector<8xf32> to vector<8x1xf32>
    %101 = vector.broadcast %100 : vector<8x1xf32> to vector<8x8xf32>
    %102 = arith.subf %98, %101 : vector<8x8xf32>
    %103 = math.exp %102 : vector<8x8xf32>
    %cst_74 = arith.constant dense<0.000000e+00> : vector<8xf32>
    %104 = vector.multi_reduction <add>, %103, %cst_74 [1] : vector<8x8xf32> to vector<8xf32>
    %105 = vector.shape_cast %104 : vector<8xf32> to vector<8x1xf32>
    %106 = tpu.reciprocal %105 {approx = true} : vector<8x1xf32> -> vector<8x1xf32>
    %107 = vector.broadcast %106 : vector<8x1xf32> to vector<8x8xf32>
    %108 = arith.mulf %103, %107 : vector<8x8xf32>
    %cst_75 = arith.constant dense<0.000000e+00> : vector<8x8xf32>
    %109 = tpu.matmul %108, %95, %cst_75 {dimension_numbers = #tpu.dot_dimension_numbers<[1], [0], [0], [1], [0, 0, 1, 1], [], []>} : vector<8x8xf32>, vector<8x8xf32>, vector<8x8xf32> -> vector<8x8xf32>
    %c0_76 = arith.constant 0 : index
    %c0_77 = arith.constant 0 : index
    %110 = vector.load %arg13[%c0_76, %c0_77] : memref<8x32xf32, #tpu.memory_space<vmem>>, vector<8x32xf32>
    %c2 = arith.constant 2 : index
    %c0_78 = arith.constant 0 : index
    %c0_79 = arith.constant 0 : index
    %111 = vector.load %arg7[%c2, %c0_78, %c0_79] : memref<4x8x32xf32, #tpu.memory_space<vmem>>, vector<1x8x32xf32>
    %112 = vector.shape_cast %111 : vector<1x8x32xf32> to vector<8x32xf32>
    %cst_80 = arith.constant dense<0.000000e+00> : vector<8x32xf32>
    %113 = tpu.matmul %109, %112, %cst_80 {dimension_numbers = #tpu.dot_dimension_numbers<[1], [0], [0], [1], [0, 0, 1, 1], [], []>} : vector<8x8xf32>, vector<8x32xf32>, vector<8x32xf32> -> vector<8x32xf32>
    %114 = arith.addf %110, %113 : vector<8x32xf32>
    %c0_81 = arith.constant 0 : index
    %c0_82 = arith.constant 0 : index
    %115 = vector.load %arg13[%c0_81, %c0_82] : memref<8x32xf32, #tpu.memory_space<vmem>>, vector<8x32xf32>
    tpu.vector_store %arg13[%c0_81, %c0_82], %114 {strides = array<i32>} : memref<8x32xf32, #tpu.memory_space<vmem>>, vector<8x32xf32>,
    %c0_83 = arith.constant 0 : index
    %c24 = arith.constant 24 : index
    %116 = vector.load %arg10[%c0_83, %c24] : memref<8x32xf32, #tpu.memory_space<vmem>>, vector<8x8xf32>
    %c0_84 = arith.constant 0 : index
    %c24_85 = arith.constant 24 : index
    %117 = vector.load %arg11[%c0_84, %c24_85] : memref<8x64xf32, #tpu.memory_space<vmem>>, vector<8x8xf32>
    %c0_86 = arith.constant 0 : index
    %c56 = arith.constant 56 : index
    %118 = vector.load %arg11[%c0_86, %c56] : memref<8x64xf32, #tpu.memory_space<vmem>>, vector<8x8xf32>
    %cst_87 = arith.constant dense<0.000000e+00> : vector<8x8xf32>
    %119 = tpu.matmul %116, %117, %cst_87 {dimension_numbers = #tpu.dot_dimension_numbers<[1], [1], [0], [0], [0, 0, 1, 0], [], []>} : vector<8x8xf32>, vector<8x8xf32>, vector<8x8xf32> -> vector<8x8xf32>
    %c0_88 = arith.constant 0 : index
    %c0_89 = arith.constant 0 : index
    %120 = vector.load %arg12[%c0_88, %c0_89] : memref<8x8xf32, #tpu.memory_space<vmem>>, vector<8x8xf32>
    %121 = arith.addf %119, %120 : vector<8x8xf32>
    %cst_90 = arith.constant dense<0xFF800000> : vector<8xf32>
    %122 = vector.multi_reduction <maximumf>, %121, %cst_90 [1] : vector<8x8xf32> to vector<8xf32>
    %123 = vector.shape_cast %122 : vector<8xf32> to vector<8x1xf32>
    %124 = vector.broadcast %123 : vector<8x1xf32> to vector<8x8xf32>
    %125 = arith.subf %121, %124 : vector<8x8xf32>
    %126 = math.exp %125 : vector<8x8xf32>
    %cst_91 = arith.constant dense<0.000000e+00> : vector<8xf32>
    %127 = vector.multi_reduction <add>, %126, %cst_91 [1] : vector<8x8xf32> to vector<8xf32>
    %128 = vector.shape_cast %127 : vector<8xf32> to vector<8x1xf32>
    %129 = tpu.reciprocal %128 {approx = true} : vector<8x1xf32> -> vector<8x1xf32>
    %130 = vector.broadcast %129 : vector<8x1xf32> to vector<8x8xf32>
    %131 = arith.mulf %126, %130 : vector<8x8xf32>
    %cst_92 = arith.constant dense<0.000000e+00> : vector<8x8xf32>
    %132 = tpu.matmul %131, %118, %cst_92 {dimension_numbers = #tpu.dot_dimension_numbers<[1], [0], [0], [1], [0, 0, 1, 1], [], []>} : vector<8x8xf32>, vector<8x8xf32>, vector<8x8xf32> -> vector<8x8xf32>
    %c0_93 = arith.constant 0 : index
    %c0_94 = arith.constant 0 : index
    %133 = vector.load %arg13[%c0_93, %c0_94] : memref<8x32xf32, #tpu.memory_space<vmem>>, vector<8x32xf32>
    %c3 = arith.constant 3 : index
    %c0_95 = arith.constant 0 : index
    %c0_96 = arith.constant 0 : index
    %134 = vector.load %arg7[%c3, %c0_95, %c0_96] : memref<4x8x32xf32, #tpu.memory_space<vmem>>, vector<1x8x32xf32>
    %135 = vector.shape_cast %134 : vector<1x8x32xf32> to vector<8x32xf32>
    %cst_97 = arith.constant dense<0.000000e+00> : vector<8x32xf32>
    %136 = tpu.matmul %132, %135, %cst_97 {dimension_numbers = #tpu.dot_dimension_numbers<[1], [0], [0], [1], [0, 0, 1, 1], [], []>} : vector<8x8xf32>, vector<8x32xf32>, vector<8x32xf32> -> vector<8x32xf32>
    %137 = arith.addf %133, %136 : vector<8x32xf32>
    %c0_98 = arith.constant 0 : index
    %c0_99 = arith.constant 0 : index
    %138 = vector.load %arg13[%c0_98, %c0_99] : memref<8x32xf32, #tpu.memory_space<vmem>>, vector<8x32xf32>
    tpu.vector_store %arg13[%c0_98, %c0_99], %137 {strides = array<i32>} : memref<8x32xf32, #tpu.memory_space<vmem>>, vector<8x32xf32>,
    %c0_100 = arith.constant 0 : index
    %c0_101 = arith.constant 0 : index
    %139 = vector.load %arg13[%c0_100, %c0_101] : memref<8x32xf32, #tpu.memory_space<vmem>>, vector<8x32xf32>
    %c0_102 = arith.constant 0 : index
    %c0_103 = arith.constant 0 : index
    %140 = vector.load %arg8[%c0_102, %c0_103] : memref<1x32xf32, #tpu.memory_space<vmem>>, vector<1x32xf32>
    %141 = vector.broadcast %140 : vector<1x32xf32> to vector<8x32xf32>
    %142 = arith.addf %139, %141 : vector<8x32xf32>
    %c0_104 = arith.constant 0 : index
    %c0_105 = arith.constant 0 : index
    %c0_106 = arith.constant 0 : index
    %143 = vector.load %arg9[%c0_104, %c0_105, %c0_106] : memref<1x8x32xf32, #tpu.memory_space<vmem>>, vector<1x8x32xf32>
    %144 = vector.shape_cast %143 : vector<1x8x32xf32> to vector<8x32xf32>
    %145 = vector.shape_cast %142 : vector<8x32xf32> to vector<1x8x32xf32>
    tpu.vector_store %arg9[%c0_104, %c0_105, %c0_106], %145 {strides = array<i32>} : memref<1x8x32xf32, #tpu.memory_space<vmem>>, vector<1x8x32xf32>,
    return
  }
  func.func @transform_0(%arg0: i32, %arg1: i32) -> (i32, i32, i32) {
    %c0_i32 = arith.constant 0 : i32
    %c0_i32_0 = arith.constant 0 : i32
    return %arg0, %arg1, %c0_i32 : i32, i32, i32
  }
  func.func @transform_1(%arg0: i32, %arg1: i32) -> (i32, i32) {
    %c0_i32 = arith.constant 0 : i32
    %c0_i32_0 = arith.constant 0 : i32
    %c0_i32_1 = arith.constant 0 : i32
    return %c0_i32, %c0_i32_0 : i32, i32
  }
  func.func @transform_2(%arg0: i32, %arg1: i32) -> (i32, i32) {
    %c0_i32 = arith.constant 0 : i32
    %c0_i32_0 = arith.constant 0 : i32
    %c0_i32_1 = arith.constant 0 : i32
    return %c0_i32, %c0_i32_0 : i32, i32
  }
  func.func @transform_3(%arg0: i32, %arg1: i32) -> (i32, i32) {
    %c0_i32 = arith.constant 0 : i32
    %c0_i32_0 = arith.constant 0 : i32
    %c0_i32_1 = arith.constant 0 : i32
    return %c0_i32, %c0_i32_0 : i32, i32
  }
  func.func @transform_4(%arg0: i32, %arg1: i32) -> (i32, i32) {
    %c0_i32 = arith.constant 0 : i32
    %c0_i32_0 = arith.constant 0 : i32
    %c0_i32_1 = arith.constant 0 : i32
    return %c0_i32, %c0_i32_0 : i32, i32
  }
  func.func @transform_5(%arg0: i32, %arg1: i32) -> (i32, i32, i32) {
    %c0_i32 = arith.constant 0 : i32
    %c0_i32_0 = arith.constant 0 : i32
    %c0_i32_1 = arith.constant 0 : i32
    %c0_i32_2 = arith.constant 0 : i32
    return %c0_i32, %c0_i32_0, %c0_i32_1 : i32, i32, i32
  }
  func.func @transform_6(%arg0: i32, %arg1: i32) -> (i32, i32) {
    %c0_i32 = arith.constant 0 : i32
    %c0_i32_0 = arith.constant 0 : i32
    %c0_i32_1 = arith.constant 0 : i32
    return %c0_i32, %c0_i32_0 : i32, i32
  }
  func.func @transform_7(%arg0: i32, %arg1: i32) -> (i32, i32, i32) {
    %c0_i32 = arith.constant 0 : i32
    %c0_i32_0 = arith.constant 0 : i32
    return %arg0, %arg1, %c0_i32 : i32, i32, i32
  }
}

</mosaic_0001>

<bundles_post_ra>
// kernel: tpu_custom_call.1
= control target key start
LH: loop header
LB: loop body
LE: loop exit
PB: predicated region body
PF: predicated region fallthrough
CT: control target
= control target key end

     0   :  { %s2543_s0 = inlined_call_operand.hbm [shape: f32[2,8,32], index: 0, kind: input, shape index: {}]   ;;  %s2544_s1 = inlined_call_operand.hbm [shape: f32[32,32], index: 1, kind: input, shape index: {}]   ;;  %s2545_s2 = inlined_call_operand.vmem [shape: f32[1,32], index: 2, kind: input, shape index: {}]   ;;  %s2546_s3 = inlined_call_operand.hbm [shape: f32[32,64], index: 3, kind: input, shape index: {}]   ;;  %s2547_s4 = inlined_call_operand.vmem [shape: f32[1,64], index: 4, kind: input, shape index: {}]   ;;  %s2548_s5 = inlined_call_operand.hbm [shape: f32[4,8,32], index: 5, kind: input, shape index: {}]   ;;  %s2549_s6 = inlined_call_operand.vmem [shape: f32[1,32], index: 6, kind: input, shape index: {}]   ;;  %s2550_s7 = inlined_call_operand.hbm [shape: f32[2,8,32], index: 7, kind: output, shape index: {}]  }
   0x1   :  { %2555 = sst [smem:[#allocation19_spill]] %s2544_s1 }
   0x2   :  { %2556 = sst [smem:[#allocation20_spill]] %s2546_s3 }
   0x3   :  { %2557 = sst [smem:[#allocation21_spill]] %s2548_s5 }
   0x4   :  { %12 = vsyncpa [#allocation7], 0 }
   0x5   :  { %14 = vsyncpa [#allocation7 + $0x1], 0 }
   0x6   :  { %15 = vsyncpa [#allocation10], 0 }
   0x7   :  { %16 = vsyncpa [#allocation13], 0 }
   0x8   :  { %17 = vsyncpa [#allocation8], 0 }
   0x9   :  { %19 = vsyncpa [#allocation8 + $0x1], 0  ;;  %s2233_s24 = smov 0   ;;  %s2235_s25 = smov 0  }
   0xa   :  { %s2237_s26 = smov 0   ;;  %s2239_s27 = smov 0  }
   0xb   :  { %s2241_s28 = smov 0   ;;  %s2243_s29 = smov 0  }
   0xc LB: > { %s1699_s30 = sadd.s32 4294967295, %s2174_s29   ;;  %s1700_s8 = sadd.s32 4294967294, %s2174_s29   ;;  %s2174_s29 = sphi %s2243_s29, %s25_s29   ;;  %s2170_s28 = sphi %s2241_s28, %s2578_s28   ;;  %s2166_s27 = sphi %s2239_s27, %s2577_s27   ;;  %s2162_s26 = sphi %s2237_s26, %s2576_s26   ;;  %s2158_s25 = sphi %s2235_s25, %s2575_s25   ;;  %s2154_s24 = sphi %s2233_s24, %s2574_s24  }
   0xd   : > { %p59_p0 = scmp.ne.s32.totalorder %s2158_s25, %s2154_s24  ;;  %p2267_p1 = scmp.eq.s32.totalorder %s1699_s30, 0 }
   0xe   : > { %p2271_p2 = scmp.eq.s32.totalorder %s1699_s30, 1  ;;  %p217_p3 = scmp.eq.s32.totalorder %s1700_s8, 1 }
   0xf   : > { %s2558_s9 = scalar_select %p2267_p1, 1, 0 }
  0x10   : > { %p2277_p4 = por %p2267_p1, %p59_p0  ;;  %p1701_p5 = scmp.ge.s32.totalorder %s2174_s29, 1 }
  0x11   : > { %p2282_p6 = por %p217_p3, %p59_p0  ;;  %p224_p7 = scmp.lt.s32.totalorder %s2174_s29, 3 }
  0x12   : > { %s2560_s11 = scalar_select %p2277_p4, 1, 0 }
  0x13   : > { %s2561_s12 = scalar_select %p2282_p6, 1, 0 }
  0x14   : > { %p2287_p8 = pnand %p1701_p5, %p224_p7  ;;  %s2176_s14 = smov [#allocation9]  }
  0x15   : > { %s236_s15 = sshll.u32 %s2176_s14, 4  ;;  %s2177_s17 = smov [#allocation11]   ;;  %s237_s15 = int_to_ptr.vmem [resolvable:$true] %s236_s15 }
  0x16   : > { %s2562_s13 = scalar_select %p2287_p8, 1, 0 }
  0x17   : > { %p1873_p9 = pneg %p2287_p8  ;;  %s252_s18 = sshll.u32 %s2177_s17, 4  ;;  %s253_s18 = int_to_ptr.vmem [resolvable:$true] %s252_s18 }
  0x18   : > { %s2178_s19 = smov [#allocation12]   ;;  %s1991_s21 = scalar_lea.vmem %s237_s15, 512 }
  0x19   : > { %p2296_p11 = pnand %p1873_p9, %p2267_p1  ;;  %s268_s20 = sshll.u32 %s2178_s19, 4  ;;  %s269_s20 = int_to_ptr.vmem [resolvable:$true] %s268_s20 }
  0x1a   : > { %p1992_p13 = scmp.ne.s32.totalorder %s237_s15, %s1991_s21  ;;  %p1999_p5 = scmp.lt.s32.totalorder %s237_s15, %s237_s15 }
  0x1b   : > { %p1982_p12 = pneg %p2296_p11  ;;  %p2000_p7 = scmp.lt.s32.totalorder %s1991_s21, %s1991_s21 }
  0x1d   : > { %p1994_p0 = pnand %p1992_p13, %p1982_p12  ;;  %p2001_p9 = por %p2000_p7, %p1999_p5 }
  0x1f   : > { %p1995_p3 = pneg %p1994_p0 }
  0x21   : > { %p2002_p10 = pnand %p2001_p9, %p1995_p3 }
  0x23   : > { %2005 = shalt.err (!%p2002_p10)
}
  0x24   : > { %s2179_s22 = smov 128   ;;  %s2180_s23 = smov 8  }
  0x25   : > { %s2564_s1 = sld [smem:[#allocation19_spill]]  ;;  %s2017_s14 = scalar_lea.vmem %s253_s18, 512 }
  0x26   : > { %p2018_p6 = scmp.ne.s32.totalorder %s253_s18, %s2017_s14  ;;  %p2025_p1 = scmp.lt.s32.totalorder %s253_s18, %s253_s18 }
  0x27   : > { %p2026_p4 = scmp.lt.s32.totalorder %s2017_s14, %s2017_s14 }
  0x28   : > { %p2020_p13 = pnand %p2018_p6, %p1982_p12 }
  0x29   : > { %p2027_p5 = por %p2026_p4, %p2025_p1 }
  0x2a   : > { %p2021_p0 = pneg %p2020_p13 }
  0x2b   : > { %1876 = dma.hbm_to_vmem [thread:$0]  (!%p2296_p11), %s2564_s1, 512, %s237_s15, [#allocation10], %s2179_s22, %s2179_s22, %s2180_s23  }
  0x2c   : > { %p2028_p3 = pnand %p2027_p5, %p2021_p0 }
  0x2e   : > { %2031 = shalt.err (!%p2028_p3)
}
  0x2f   : > { %s2565_s3 = sld [smem:[#allocation20_spill]]  ;;  %s2043_s15 = scalar_lea.vmem %s269_s20, 512 }
  0x30   : > { %p2044_p10 = scmp.ne.s32.totalorder %s269_s20, %s2043_s15  ;;  %p2051_p9 = scmp.lt.s32.totalorder %s269_s20, %s269_s20 }
  0x31   : > { %p2052_p13 = scmp.lt.s32.totalorder %s2043_s15, %s2043_s15 }
  0x32   : > { %p2046_p7 = pnand %p2044_p10, %p1982_p12 }
  0x33   : > { %p2053_p8 = por %p2052_p13, %p2051_p9 }
  0x34   : > { %p2047_p6 = pneg %p2046_p7 }
  0x35   : > { %1879 = dma.hbm_to_vmem [thread:$0]  (!%p2296_p11), %s2565_s3, 512, %s253_s18, [#allocation10], %s2179_s22, %s2179_s22, %s2180_s23  }
  0x36   : > { %p2054_p1 = pnand %p2053_p8, %p2047_p6 }
  0x38   : > { %2057 = shalt.err (!%p2054_p1)
}
  0x39   : > { %s2566_s5 = sld [smem:[#allocation21_spill]]  ;;  %s46_s18 = sadd.s32 1, %s2162_s26 }
  0x3a   : > { %s37_s8 = sadd.s32 1, %s2170_s28  ;;  %p53_p4 = scmp.ne.s32.totalorder %s2162_s26, %s2158_s25 }
  0x3b   : > { %p39_p8 = scmp.ge.s32.totalorder %s37_s8, 2  ;;  %p54_p12 = scmp.eq.s32.totalorder %s2174_s29, 0 }
  0x3c   : > { %p2333_p0 = por %p2271_p2, %p53_p4  ;;  %p1894_p5 = scmp.lt.s32.totalorder %s2174_s29, 2 }
  0x3d   : > { %s2580_s8 = smov (%p39_p8, %s37_s8), 0  ;;  %p55_p3 = por %p54_p12, %p53_p4 }
  0x3e   : > { %s285_s14 = sand.u32 1, %s2162_s26   ;;  %s41_s17 = ssub.s32 %s2170_s28, %s2580_s8 }
  0x3f   : > { %1882 = dma.hbm_to_vmem [thread:$0]  (!%p2296_p11), %s2566_s5, 512, %s269_s20, [#allocation13], %s2179_s22, %s2179_s22, %s2180_s23  }
  0x40   : > { %p44_p10 = scmp.eq.s32.totalorder %s41_s17, 0  ;;  %s1706_s20 = sshll.u32 %s285_s14, 3 }
  0x41   : > { %s1707_s22 = sshll.u32 %s2170_s28, 7  ;;  %s289_s21 = scalar_lea.vmem [#allocation6], %s1706_s20 }
  0x42   : > { %s2345_s23 = scalar_select %p44_p10, %s2162_s26, %s46_s18  }
  0x43   : > { %s295_s10 = scalar_lea.hbm %s2543_s0, %s1707_s22  ;;  %s297_s30 = sshll.u32 %s289_s21, 4  ;;  %s298_s30 = int_to_ptr.vmem [resolvable:$true] %s297_s30 }
  0x44   : > { %p2352_p2 = pnand %p1894_p5, %p55_p3  ;;  %s286_s3 = scalar_lea.sflag [#allocation7], %s285_s14 }
  0x45   : > { %s2071_s17 = scalar_lea.vmem %s298_s30, 128  ;;  %s2181_s18 = smov [#allocation6]  }
  0x46   : > { %p2060_p11 = pneg %p2352_p2  ;;  %p2072_p7 = scmp.ne.s32.totalorder %s298_s30, %s2071_s17 }
  0x47   : > { %s2076_s5 = sshll.u32 %s2181_s18, 4  ;;  %s2077_s5 = int_to_ptr.vmem [resolvable:$false] %s2076_s5 }
  0x48   : > { %p2074_p6 = pnand %p2072_p7, %p2060_p11  ;;  %s2078_s22 = scalar_lea.vmem %s2077_s5, 256 }
  0x49   : > { %p2079_p13 = scmp.lt.s32.totalorder %s298_s30, %s2077_s5  ;;  %p2080_p1 = scmp.lt.s32.totalorder %s2078_s22, %s2071_s17 }
  0x4a   : > { %p2075_p9 = pneg %p2074_p6 }
  0x4b   : > { %p2081_p4 = por %p2080_p1, %p2079_p13 }
  0x4d   : > { %p2082_p8 = pnand %p2081_p4, %p2075_p9 }
  0x4f   : > { %2085 = shalt.err (!%p2082_p8)
}
  0x50   : > { %1886 = dma.hbm_to_vmem [thread:$0]  (!%p2352_p2), %s295_s10, 128, %s298_s30, %s286_s3  }
  0x51   : > { %p2569_p12 = scmp.ne.s32.totalorder %s2562_s13, 0 }
  0x52   : > { %s2363_s14 = sand.u32 (!%p2569_p12), 1, %s2158_s25   ;;  %p2570_p5 = scmp.ne.s32.totalorder (!%p2569_p12), %s2560_s11, 0 }
  0x53   : > { %306 = sbr.rel (%p2569_p12) target bundleno = 2761 (0xac9), region = 48  ;;  %s1709_s20 = sshll.u32 (!%p2569_p12), %s2363_s14, 3 }
  0x54   : > { %s309_s19 = scalar_lea.sflag (!%p2569_p12), [#allocation7], %s2363_s14  ;;  %s2369_s5 = scalar_lea.vmem (!%p2569_p12), [#allocation6], %s1709_s20 }
  0x58   : > { %2137 = dma.done.wait (%p2570_p5), %s309_s19, 128  }
  0x59   : > { %2139 = vsyncadd (%p2570_p5), %s309_s19, 4294967168  ;;  %p2571_p3 = scmp.ne.s32.totalorder %s2558_s9, 0 }
  0x5b   : > { %2141 = dma.done.wait (%p2571_p3), [#allocation10], 1024  }
  0x5c   : > { %2143 = vsyncadd (%p2571_p3), [#allocation10], 4294966272 }
  0x5d   : > { %2145 = dma.done.wait (%p2571_p3), [#allocation13], 512  }
  0x5e   : > { %2147 = vsyncadd (%p2571_p3), [#allocation13], 4294966784  ;;  %vm367_vm0 = vcmask 261120   ;;  %v2182_v0 = vmov 0.0   ;;  %vm2183_vm1 = vmmov 0   ;;  %v446_v1 = vld [vmem:[#allocation11 + $0x18] sm:$0xff]  ;;  %v530_v16 = vlaneseq }
  0x5f   : > { %1786 = vmatprep.subr.mxu1 %v2182_v0  ;;  %1775 = vmatprep.subr.mxu0 %v2182_v0  ;;  %576 = vst.msk [vmem:[#allocation5] sm:$0xff] %vm367_vm0, %v2182_v0  ;;  %v359_v2 = vld [vmem:[#allocation9 + $0x18] sm:$0xff]  ;;  %v445_v3 = vld [vmem:[#allocation11 + $0x10] sm:$0xff]  ;;  %v444_v5 = vld [vmem:[#allocation11 + $0x8] sm:$0xff]  ;;  %vm527_vm2 = vcmask 523264   ;;  %vm568_vm4 = vcmask 64512  }
  0x60   : > { %1794 = vmatprep.mubr.msk.f32.mxu1 %vm2183_vm1, %v2182_v0  ;;  %1783 = vmatprep.mubr.msk.f32.mxu0 %vm2183_vm1, %v2182_v0  ;;  %v358_v4 = vld [vmem:[#allocation9 + $0x10] sm:$0xff]  ;;  %v357_v6 = vld [vmem:[#allocation9 + $0x8] sm:$0xff]  ;;  %v443_v7 = vld [vmem:[#allocation11] sm:$0xff]  ;;  %v531_v19 = vshrl.u32 %v530_v16, 7  ;;  %v535_v22 = vand.u32 127, %v530_v16  ;;  %s2184_s13 = smov 96  }
  0x61   : > { %1787 = vmatpush3.msra.mxu1 %v446_v1  ;;  %1776 = vmatpush3.msra.mxu0 %v359_v2  ;;  %v356_v8 = vld [vmem:[#allocation9] sm:$0xff]  ;;  %v442_v9 = vld [vmem:[%s2369_s5] sm:$0xff]  ;;  %v2185_v29 = vmov 0   ;;  %s2186_s15 = smov 120   ;;  %s2187_s10 = smov 88  }
  0x62   : > { %1788 = vmatprep.subr.mxu1 %v2182_v0  ;;  %1777 = vmatprep.subr.mxu0 %v2182_v0  ;;  %v1716_v10 = vld [vmem:[%s2547_s4] ss:$0 sm:$0xff]  ;;  %v1718_v20 = vadd.s32 4294967293, %v531_v19  ;;  %v539_v21 = vadd.s32 3, %v531_v19  ;;  %v745_v56 = vld [vmem:[#allocation12] sm:$0xff]  ;;  %s2188_s21 = smov 112  }
  0x63   : > { %1789 = vmatpush3.msra.mxu1 %v445_v3  ;;  %1778 = vmatpush3.msra.mxu0 %v358_v4  ;;  %v1714_v11 = vld [vmem:[%s2545_s2] ss:$0 sm:$0xff]  ;;  %s2189_s30 = smov 80   ;;  %s2190_s17 = smov 104  }
  0x64   : > { %1790 = vmatprep.subr.mxu1 %v2182_v0  ;;  %1779 = vmatprep.subr.mxu0 %v2182_v0  ;;  %vm537_vm3 = vcmp.gt.s32.totalorder %v1718_v20, 0  ;;  %v540_v23 = vadd.s32 1, %v539_v21  ;;  %s2191_s18 = smov 72   ;;  %s1738_s5 = sshll.u32 %s2166_s27, 7 }
  0x65   : > { %1791 = vmatpush3.msra.mxu1 %v444_v5  ;;  %1780 = vmatpush3.msra.mxu0 %v357_v6  ;;  %v538_v24 = vsel %vm537_vm3, %v1718_v20, 0  ;;  %s354_s1 = scalar_lea.vmem [#allocation14], %s1709_s20 }
  0x66   : > { %1792 = vmatprep.subr.mxu1 %v2182_v0  ;;  %1781 = vmatprep.subr.mxu0 %v2182_v0  ;;  %vm541_vm5 = vcmp.lt.s32.totalorder %v540_v23, 8  ;;  %vm554_vm6 = vcmp.eq.s32.totalorder %v538_v24, 0  ;;  %vm544_vm7 = vcmp.ge.s32.totalorder %v535_v22, %v538_v24  ;;  %v744_v6 = vld [vmem:[#allocation5] sm:$0xff]  ;;  %s1590_s3 = sshll.u32 %s354_s1, 4  ;;  %s1591_s3 = int_to_ptr.vmem [resolvable:$true] %s1590_s3 }
  0x67   : > { %1793 = vmatpush3.msra.mxu1 %v443_v7  ;;  %1782 = vmatpush3.msra.mxu0 %v356_v8  ;;  %v542_v26 = vsel %vm541_vm5, %v540_v23, 8  ;;  %v555_v30 = vsel %vm554_vm6, 7, %v2185_v29 }
  0x68   : > { %1795 = vmatmul.mubr.msk.f32.vlgmr.msra.gmra.mxu1 %vm367_vm0, %v442_v9  ;;  %1784 = vmatmul.mubr.msk.f32.vlgmr.msra.gmra.mxu0 %vm367_vm0, %v442_v9  ;;  %vm545_vm8 = vcmp.lt.s32.totalorder %v535_v22, %v542_v26  ;;  %v551_v28 = vsub.s32 %v542_v26, %v538_v24  ;;  %vm559_vm10 = vcmp.eq.s32.totalorder %v535_v22, %v555_v30 }
  0x69   : > { %1797 = vmatprep.subr.mxu0 %v2182_v0  ;;  %1799 = vmatprep.mubr.msk.f32.mxu0 %vm2183_vm1, %v2182_v0  ;;  %vm546_vm9 = vmand %vm544_vm7, %vm545_vm8 }
  0x6a   : > { %1802 = vmatprep.subr.mxu1 %v2182_v0  ;;  %1804 = vmatprep.mubr.msk.f32.mxu1 %vm2183_vm1, %v2182_v0  ;;  %v552_v31 = vsub.s32 7, %v551_v28  ;;  %v1719_v33 = vsel %vm546_vm9, 1.0, %v2182_v0 }
  0x6c   : > { %v553_v32 = vcvt.s32.f32 %v552_v31 }
  0x6e   : > { %vm558_vm11 = vcmp.gt.f32.partialorder %v553_v32, 0.0 }
  0x6f   : > { %vm560_vm12 = vmand %vm558_vm11, %vm559_vm10 }
  0x70   : > { %v561_v34 = vsel %vm560_vm12, %v553_v32, 0.0 }
  0x71   : > { %v562_v35 = vadd.f32 %v1719_v33, %v561_v34 }
  0x73   : > { %v564_v36 = vmax.f32 %v562_v35, 1.0  ;;  %vm563_vm13 = vcmp.gt.f32.partialorder %v562_v35, 0.0 }
  0x75   : > { %1962 = vlog2.f32 %v564_v36 }
  0x82   : > { %v1963_v37 = vpop.eup %1962 }
  0x83   : > { %v566_v38 = vmul.f32 0.6931472, %v1963_v37 }
  0x85   : > { %v567_v39 = vsel %vm563_vm13, %v566_v38, -1e+30  ;;  %v1241_v38 = vld [vmem:[#allocation12 + $0x10] sm:$0xff] }
  0x86   : > { %569 = vst.msk [vmem:[#allocation4] sm:$0xff] %vm568_vm4, %v567_v39 }
  0x8d   : > { %v2430_v41 = vld [vmem:[#allocation4] sm:$0xff] }
 0x128   : > { %v523_v12 = vpop.f32.mrf.mxu1  ;;  %v437_v13 = vpop.f32.mrf.mxu0 }
 0x129   : > { %v524_v14 = vadd.f32 %v1716_v10, %v523_v12  ;;  %v438_v15 = vadd.f32 %v1714_v11, %v437_v13 }
 0x12a   : > { %v1796_v17 = vpop.f32.mrf.mxu1  ;;  %v1785_v18 = vpop.f32.mrf.mxu0 }
 0x12b   : > { %528 = vst.msk [vmem:[#allocation3] sm:$0xff] %vm527_vm2, %v524_v14 }
 0x12c   : > { %441 = vst.msk [vmem:[#allocation2] sm:$0xff] %vm367_vm0, %v438_v15  ;;  %v993_v15 = vld [vmem:[#allocation12 + $0x8] sm:$0xff] }
 0x132   : > { %v2413_v25 = vld [vmem:[#allocation3] sm:$0xff] }
 0x133   : > { %668 = vrot.lane.b32.xlu1 %v2413_v25, %s2184_s13  ;;  %1798 = vmatpush3.xpose.msk.msra.mxu0 %vm568_vm4, %v2413_v25  ;;  %v2418_v27 = vld [vmem:[#allocation2] sm:$0xff]  ;;  %s1588_s13 = scalar_lea.hbm %s2550_s7, %s1738_s5 }
 0x134   : > { %1807 = vmatprep.subr.mxu0 %v2182_v0 }
 0x136   : > { %1800 = vmatmul.mubr.msk.f32.vlgmr.msra.gmra.mxu0 %vm568_vm4, %v2418_v27 }
 0x137   : > { %828 = vrot.lane.b32.xlu1 %v2413_v25, %s2186_s15  ;;  %1809 = vmatprep.mubr.msk.f32.mxu0 %vm2183_vm1, %v2182_v0 }
 0x138   : > { %1808 = vmatpush3.msra.mxu0 %v745_v56 }
 0x139   : > { %1817 = vmatprep.subr.mxu0 %v2182_v0 }
 0x1a5   : > { %v669_v40 = vpop.permute.xlu1 %668 }
 0x1a6   : > { %1803 = vmatpush3.msra.mxu1 %v669_v40 }
 0x1a7   : > { %1812 = vmatprep.subr.mxu1 %v2182_v0 }
 0x1a9   : > { %v829_v54 = vpop.permute.xlu1 %828 }
 0x1f6   : > { %v653_v42 = vpop.f32.mrf.mxu0 }
 0x1f7   : > { %v654_v43 = vadd.f32 %v653_v42, %v2430_v41 }
 0x1f8   : > { %v1801_v44 = vpop.f32.mrf.mxu0 }
 0x1f9   : > { %v657_v45 = vsel %vm568_vm4, %v654_v43, -inf }
 0x1fa   : > { %658 = vmax.xlane.f32.xlu0 %v657_v45 }
 0x283   : > { %v659_v46 = vpop.xlane.xlu0 %658 }
 0x284   : > { %v660_v47 = vsub.f32 %v654_v43, %v659_v46 }
 0x286   : > { %v661_v48 = vmul.f32 1.442695, %v660_v47 }
 0x288   : > { %1964 = vpow2.f32 %v661_v48 }
 0x295   : > { %v1965_v49 = vpop.eup %1964 }
 0x296   : > { %v663_v50 = vsel %vm568_vm4, %v1965_v49, 0.0 }
 0x297   : > { %664 = vadd.xlane.f32.xlu0 %v663_v50 }
 0x2ad   : > { %825 = vrot.lane.b32.xlu0 %v2418_v27, %s2186_s15  ;;  %s1576_s15 = scalar_lea.sflag [#allocation8], %s2363_s14 }
 0x320   : > { %v665_v51 = vpop.xlane.xlu0 %664 }
 0x321   : > { %1966 = vrcp.f32 %v665_v51 }
 0x324   : > { %v826_v55 = vpop.permute.xlu0 %825 }
 0x32e   : > { %v1967_v52 = vpop.eup %1966 }
 0x32f   : > { %v667_v53 = vmul.f32 %v1967_v52, %v1965_v49 }
 0x331   : > { %1805 = vmatmul.mubr.msk.f32.vlgmr.msra.gmra.mxu1 %vm568_vm4, %v667_v53 }
 0x332   : > { %1813 = vmatpush3.xpose.msk.msra.mxu1 %vm568_vm4, %v829_v54  ;;  %1814 = vmatprep.mubr.msk.f32.mxu1 %vm2183_vm1, %v2182_v0 }
 0x333   : > { %1822 = vmatprep.subr.mxu1 %v2182_v0 }
 0x335   : > { %1815 = vmatmul.mubr.msk.f32.vlgmr.msra.gmra.mxu1 %vm568_vm4, %v826_v55 }
 0x336   : > { %1824 = vmatprep.mubr.msk.f32.mxu1 %vm2183_vm1, %v2182_v0  ;;  %1823 = vmatpush3.msra.mxu1 %v993_v15 }
 0x337   : > { %1832 = vmatprep.subr.mxu1 %v2182_v0 }
 0x3f1   : > { %v740_v57 = vpop.f32.mrf.mxu1 }
 0x3f2   : > { %1810 = vmatmul.mubr.msk.f32.vlgmr.msra.gmra.mxu0 %vm568_vm4, %v740_v57 }
 0x3f3   : > { %v1806_v58 = vpop.f32.mrf.mxu1  ;;  %1819 = vmatprep.mubr.msk.f32.mxu0 %vm2183_vm1, %v2182_v0 }
 0x3f5   : > { %v900_v59 = vpop.f32.mrf.mxu1 }
 0x3f6   : > { %v901_v60 = vadd.f32 %v900_v59, %v2430_v41 }
 0x3f7   : > { %v1816_v61 = vpop.f32.mrf.mxu1 }
 0x3f8   : > { %v904_v62 = vsel %vm568_vm4, %v901_v60, -inf }
 0x3f9   : > { %905 = vmax.xlane.f32.xlu1 %v904_v62 }
 0x40a   : > { %915 = vrot.lane.b32.xlu1 %v2413_v25, %s2187_s10  ;;  %s2086_s10 = scalar_lea.vmem %s1591_s3, 128 }
 0x40b   : > { %p2087_p10 = scmp.ne.s32.totalorder %s1591_s3, %s2086_s10 }
 0x40d   : > { %p2088_p2 = pnand %p2087_p10, %p2333_p0 }
 0x40e   : > { %1073 = vrot.lane.b32.xlu1 %v2418_v27, %s2188_s21 }
 0x40f   : > { %p2089_p11 = pneg %p2088_p2 }
 0x482   : > { %v906_v63 = vpop.xlane.xlu1 %905 }
 0x483   : > { %v907_v1 = vsub.f32 %v901_v60, %v906_v63  ;;  %v1736_v63 = vld [vmem:[%s2549_s6] ss:$0 sm:$0xff] }
 0x485   : > { %v908_v2 = vmul.f32 1.442695, %v907_v1 }
 0x486   : > { %v916_v3 = vpop.permute.xlu1 %915 }
 0x487   : > { %1968 = vpow2.f32 %v908_v2  ;;  %1818 = vmatpush3.msra.mxu0 %v916_v3 }
 0x488   : > { %1827 = vmatprep.subr.mxu0 %v2182_v0 }
 0x48a   : > { %v1074_v14 = vpop.permute.xlu1 %1073 }
 0x494   : > { %v1969_v4 = vpop.eup %1968 }
 0x495   : > { %v910_v5 = vsel %vm568_vm4, %v1969_v4, 0.0 }
 0x496   : > { %911 = vadd.xlane.f32.xlu0 %v910_v5 }
 0x4ac   : > { %1076 = vrot.lane.b32.xlu0 %v2413_v25, %s2188_s21  ;;  %s2192_s21 = smov [#allocation14]  }
 0x4ad   : > { %s2090_s27 = sshll.u32 %s2192_s21, 4  ;;  %s2091_s27 = int_to_ptr.vmem [resolvable:$false] %s2090_s27 }
 0x4ae   : > { %s2092_s20 = scalar_lea.vmem %s2091_s27, 256  ;;  %p2093_p7 = scmp.lt.s32.totalorder %s1591_s3, %s2091_s27 }
 0x4af   : > { %p2094_p6 = scmp.lt.s32.totalorder %s2092_s20, %s2086_s10 }
 0x4b1   : > { %p2095_p9 = por %p2094_p6, %p2093_p7 }
 0x4b2   : > { %v815_v7 = vpop.f32.mrf.mxu0 }
 0x4b3   : > { %v819_v8 = vadd.f32 %v815_v7, %v744_v6  ;;  %p2096_p13 = pnand %p2095_p9, %p2089_p11 }
 0x4b4   : > { %v1811_v9 = vpop.f32.mrf.mxu0 }
 0x4b5   : > { %820 = vst.msk [vmem:[#allocation5] sm:$0xff] %vm367_vm0, %v819_v8 }
 0x4bc   : > { %v991_v30 = vld [vmem:[#allocation5] sm:$0xff] }
 0x51f   : > { %v912_v10 = vpop.xlane.xlu0 %911 }
 0x520   : > { %1970 = vrcp.f32 %v912_v10 }
 0x523   : > { %v1077_v13 = vpop.permute.xlu0 %1076 }
 0x52d   : > { %v1971_v11 = vpop.eup %1970 }
 0x52e   : > { %v914_v12 = vmul.f32 %v1971_v11, %v1969_v4 }
 0x530   : > { %1820 = vmatmul.mubr.msk.f32.vlgmr.msra.gmra.mxu0 %vm568_vm4, %v914_v12 }
 0x531   : > { %1828 = vmatpush3.xpose.msk.msra.mxu0 %vm568_vm4, %v1077_v13  ;;  %1829 = vmatprep.mubr.msk.f32.mxu0 %vm2183_vm1, %v2182_v0 }
 0x532   : > { %1837 = vmatprep.subr.mxu0 %v2182_v0 }
 0x534   : > { %1830 = vmatmul.mubr.msk.f32.vlgmr.msra.gmra.mxu0 %vm568_vm4, %v1074_v14 }
 0x535   : > { %1839 = vmatprep.mubr.msk.f32.mxu0 %vm2183_vm1, %v2182_v0  ;;  %1838 = vmatpush3.msra.mxu0 %v1241_v38 }
 0x536   : > { %1847 = vmatprep.subr.mxu0 %v2182_v0 }
 0x5f0   : > { %v987_v16 = vpop.f32.mrf.mxu0 }
 0x5f1   : > { %1825 = vmatmul.mubr.msk.f32.vlgmr.msra.gmra.mxu1 %vm568_vm4, %v987_v16 }
 0x5f2   : > { %v1821_v17 = vpop.f32.mrf.mxu0  ;;  %1834 = vmatprep.mubr.msk.f32.mxu1 %vm2183_vm1, %v2182_v0 }
 0x5f4   : > { %v1148_v18 = vpop.f32.mrf.mxu0 }
 0x5f5   : > { %v1149_v19 = vadd.f32 %v1148_v18, %v2430_v41 }
 0x5f6   : > { %v1831_v20 = vpop.f32.mrf.mxu0 }
 0x5f7   : > { %v1152_v21 = vsel %vm568_vm4, %v1149_v19, -inf }
 0x5f8   : > { %1153 = vmax.xlane.f32.xlu1 %v1152_v21 }
 0x609   : > { %1163 = vrot.lane.b32.xlu1 %v2413_v25, %s2189_s30 }
 0x60d   : > { %1321 = vrot.lane.b32.xlu1 %v2418_v27, %s2190_s17 }
 0x681   : > { %v1154_v22 = vpop.xlane.xlu1 %1153 }
 0x682   : > { %v1155_v23 = vsub.f32 %v1149_v19, %v1154_v22 }
 0x684   : > { %v1156_v24 = vmul.f32 1.442695, %v1155_v23 }
 0x685   : > { %v1164_v26 = vpop.permute.xlu1 %1163 }
 0x686   : > { %1972 = vpow2.f32 %v1156_v24  ;;  %1833 = vmatpush3.msra.mxu1 %v1164_v26 }
 0x687   : > { %1842 = vmatprep.subr.mxu1 %v2182_v0 }
 0x689   : > { %v1322_v37 = vpop.permute.xlu1 %1321 }
 0x693   : > { %v1973_v28 = vpop.eup %1972 }
 0x694   : > { %v1158_v29 = vsel %vm568_vm4, %v1973_v28, 0.0 }
 0x695   : > { %1159 = vadd.xlane.f32.xlu0 %v1158_v29 }
 0x6ab   : > { %1324 = vrot.lane.b32.xlu0 %v2413_v25, %s2190_s17 }
 0x6b1   : > { %v1063_v31 = vpop.f32.mrf.mxu1 }
 0x6b2   : > { %v1067_v32 = vadd.f32 %v1063_v31, %v991_v30 }
 0x6b3   : > { %v1826_v33 = vpop.f32.mrf.mxu1 }
 0x6b4   : > { %1068 = vst.msk [vmem:[#allocation5] sm:$0xff] %vm367_vm0, %v1067_v32 }
 0x71e   : > { %v1160_v27 = vpop.xlane.xlu0 %1159 }
 0x71f   : > { %1974 = vrcp.f32 %v1160_v27 }
 0x722   : > { %v1325_v36 = vpop.permute.xlu0 %1324 }
 0x72c   : > { %v1975_v34 = vpop.eup %1974 }
 0x72d   : > { %v1162_v35 = vmul.f32 %v1975_v34, %v1973_v28 }
 0x72f   : > { %1835 = vmatmul.mubr.msk.f32.vlgmr.msra.gmra.mxu1 %vm568_vm4, %v1162_v35 }
 0x730   : > { %1843 = vmatpush3.xpose.msk.msra.mxu1 %vm568_vm4, %v1325_v36  ;;  %1844 = vmatprep.mubr.msk.f32.mxu1 %vm2183_vm1, %v2182_v0 }
 0x731   : > { %1852 = vmatprep.subr.mxu1 %v2182_v0 }
 0x733   : > { %1845 = vmatmul.mubr.msk.f32.vlgmr.msra.gmra.mxu1 %vm568_vm4, %v1322_v37 }
 0x734   : > { %1854 = vmatprep.mubr.msk.f32.mxu1 %vm2183_vm1, %v2182_v0 }
 0x7ef   : > { %v1235_v39 = vpop.f32.mrf.mxu1 }
 0x7f0   : > { %1840 = vmatmul.mubr.msk.f32.vlgmr.msra.gmra.mxu0 %vm568_vm4, %v1235_v39 }
 0x7f1   : > { %v1836_v40 = vpop.f32.mrf.mxu1  ;;  %1849 = vmatprep.mubr.msk.f32.mxu0 %vm2183_vm1, %v2182_v0  ;;  %v1489_v0 = vld [vmem:[#allocation12 + $0x18] sm:$0xff] }
 0x7f2   : > { %1853 = vmatpush3.msra.mxu1 %v1489_v0 }
 0x7f3   : > { %v1396_v42 = vpop.f32.mrf.mxu1 }
 0x7f4   : > { %v1397_v43 = vadd.f32 %v1396_v42, %v2430_v41  ;;  %v1239_v41 = vld [vmem:[#allocation5] sm:$0xff] }
 0x7f5   : > { %v1846_v44 = vpop.f32.mrf.mxu1 }
 0x7f6   : > { %v1400_v45 = vsel %vm568_vm4, %v1397_v43, -inf }
 0x7f7   : > { %1401 = vmax.xlane.f32.xlu1 %v1400_v45 }
 0x808   : > { %1411 = vrot.lane.b32.xlu1 %v2413_v25, %s2191_s18 }
 0x880   : > { %v1402_v46 = vpop.xlane.xlu1 %1401 }
 0x881   : > { %v1403_v47 = vsub.f32 %v1397_v43, %v1402_v46 }
 0x883   : > { %v1404_v48 = vmul.f32 1.442695, %v1403_v47 }
 0x884   : > { %v1412_v49 = vpop.permute.xlu1 %1411 }
 0x885   : > { %1976 = vpow2.f32 %v1404_v48  ;;  %1848 = vmatpush3.msra.mxu0 %v1412_v49 }
 0x892   : > { %v1977_v50 = vpop.eup %1976 }
 0x893   : > { %v1406_v51 = vsel %vm568_vm4, %v1977_v50, 0.0 }
 0x894   : > { %1407 = vadd.xlane.f32.xlu0 %v1406_v51 }
 0x8b0   : > { %v1311_v52 = vpop.f32.mrf.mxu0 }
 0x8b1   : > { %v1315_v53 = vadd.f32 %v1311_v52, %v1239_v41 }
 0x8b2   : > { %v1841_v54 = vpop.f32.mrf.mxu0 }
 0x8b3   : > { %1316 = vst.msk [vmem:[#allocation5] sm:$0xff] %vm367_vm0, %v1315_v53 }
 0x8ba   : > { %v1487_v59 = vld [vmem:[#allocation5] sm:$0xff] }
 0x91d   : > { %v1408_v25 = vpop.xlane.xlu0 %1407 }
 0x91e   : > { %1978 = vrcp.f32 %v1408_v25 }
 0x92b   : > { %v1979_v55 = vpop.eup %1978 }
 0x92c   : > { %v1410_v56 = vmul.f32 %v1979_v55, %v1977_v50 }
 0x92e   : > { %1850 = vmatmul.mubr.msk.f32.vlgmr.msra.gmra.mxu0 %vm568_vm4, %v1410_v56 }
 0x9ee   : > { %v1483_v57 = vpop.f32.mrf.mxu0 }
 0x9ef   : > { %1855 = vmatmul.mubr.msk.f32.vlgmr.msra.gmra.mxu1 %vm568_vm4, %v1483_v57 }
 0x9f0   : > { %v1851_v58 = vpop.f32.mrf.mxu0 }
 0xaaf   : > { %v1559_v60 = vpop.f32.mrf.mxu1 }
 0xab0   : > { %v1563_v61 = vadd.f32 %v1559_v60, %v1487_v59 }
 0xab1   : > { %v1856_v62 = vpop.f32.mrf.mxu1 }
 0xab2   : > { %1564 = vst.msk [vmem:[#allocation5] sm:$0xff] %vm367_vm0, %v1563_v61 }
 0xab9   : > { %v1565_v1 = vld [vmem:[#allocation5] sm:$0xff] }
 0xaba   : > { %v1573_v2 = vadd.f32 %v1736_v63, %v1565_v1 }
 0xabc   : > { %1574 = vst.msk [vmem:[%s354_s1] sm:$0xff] %vm367_vm0, %v1573_v2 }
 0xabd   : > { %2099 = shalt.err (!%p2096_p13)
}
 0xabe   : > { %s2100_s30 = scalar_lea.hbm %s1588_s13, 128  ;;  %s2104_s18 = scalar_lea.hbm %s2550_s7, 256 }
 0xabf   : > { %p2101_p1 = scmp.ne.s32.totalorder %s1588_s13, %s2100_s30  ;;  %p2105_p12 = scmp.lt.s32.totalorder %s1588_s13, %s2550_s7 }
 0xac0   : > { %p2106_p5 = scmp.lt.s32.totalorder %s2104_s18, %s2100_s30 }
 0xac1   : > { %p2102_p4 = pnand %p2101_p1, %p2333_p0 }
 0xac2   : > { %p2107_p3 = por %p2106_p5, %p2105_p12 }
 0xac3   : > { %p2103_p8 = pneg %p2102_p4 }
 0xac5   : > { %p2108_p10 = pnand %p2107_p3, %p2103_p8 }
 0xac7   : > { %2111 = shalt.err (!%p2108_p10)
}
 0xac8   : > { %1871 = dma.vmem_to_hbm [thread:$0]  (%p2333_p0), %s1591_s3, 128, %s1588_s13, %s1576_s15  }
 0xac9 PF: > { %s1602_s5 = sand.u32 1, %s2154_s24   ;;  %p2572_p2 = scmp.ne.s32.totalorder %s2561_s12, 0 }
 0xaca   : > { %p2573_p11 = scmp.ge.s32.totalorder %s2174_s29, 2  ;;  %s1603_s1 = scalar_lea.sflag [#allocation8], %s1602_s5 }
 0xacc   : > { %p1888_p7 = pnand %p2573_p11, %p2572_p2 }
 0xace   : > { %p1889_p6 = pneg %p1888_p7 }
 0xad0   : > { %2149 = dma.done.wait (%p1889_p6), %s1603_s1, 128  }
 0xad1   : > { %2151 = vsyncadd (%p1889_p6), %s1603_s1, 4294967168  ;;  %s25_s29 = sadd.s32 1, %s2174_s29   ;;  %s2574_s24 = smov %s2158_s25 }
 0xad2   : > { %p22_p9 = scmp.ge.s32.totalorder %s25_s29, 4   ;;  %s2575_s25 = smov %s2162_s26 }
 0xad3   : > { %s2576_s26 = smov %s2345_s23  ;;  %s2577_s27 = smov %s2170_s28 }
 0xad4   : > { %s2578_s28 = smov %s2580_s8  ;;  %24 = sbr.rel (!%p22_p9) target bundleno = 12 (0xc), region = 116 }
 0xad9   :  { %1608 = vsyncpa [#allocation7], 1 }
 0xada   :  { %1610 = vsyncpa [#allocation7 + $0x1], 1 }
 0xadb   :  { %1611 = vsyncpa [#allocation10], 1 }
 0xadc   :  { %1612 = vsyncpa [#allocation13], 1 }
 0xadd   :  { %1613 = vsyncpa [#allocation8], 1 }
 0xade   :  { %1615 = vsyncpa [#allocation8 + $0x1], 1 }

</bundles_post_ra>
